<compile_context>
chip_gen: v7x
topology: tpu7x:2x2x1
jax: 0.10.0
libtpu: 0.0.40
codegen_flags: <defaults>
</compile_context>

<pallas_src>
import jax
import jax.numpy as jnp
from jax.experimental import pallas as pl
from jax.experimental.pallas import tpu as pltpu


def _round_up(x, m):
    return ((x + m - 1) // m) * m


def _sublane_align(dtype):
    # Minimum sublane tile per dtype: 8 for 32-bit, 16 for bf16, 32 for int8.
    return max(8, 32 // jnp.dtype(dtype).itemsize)


def _linear_relu_kernel(x_ref, w_ref, b_ref, o_ref):
    # x_ref: (tm, K), w_ref: (K, N), b_ref: (1, N), o_ref: (tm, N)
    y = jnp.dot(x_ref[...], w_ref[...], preferred_element_type=jnp.float32)
    y = y + b_ref[...].astype(jnp.float32)          # broadcast bias over rows
    o_ref[...] = jnp.maximum(y, 0.0).astype(o_ref.dtype)


def linear_subsampling1(x, weight_t, bias, *, tm=8192, io_dtype=None, out_dtype=None):
    """LinearSubsampling1 forward.

    x: (B, T, idim); weight_t: (idim, odim) == PyTorch weight.T; bias: (odim,)
    tm: row tile in *original* rows of the flattened (B*T, idim) matrix.
    io_dtype:  optional narrower dtype (e.g. jnp.bfloat16) for x/weight/bias
               HBM reads; accumulation stays f32.
    out_dtype: output dtype; defaults to io_dtype if set, else x.dtype
               (narrow output cuts the dominant write traffic ~2x).
    Returns (B, T, odim).
    """
    B, T, idim = x.shape
    odim = weight_t.shape[1]
    M = B * T

    if out_dtype is None:
        out_dtype = io_dtype if io_dtype is not None else x.dtype
    if io_dtype is not None:
        x = x.astype(io_dtype)
        weight_t = weight_t.astype(io_dtype)
        bias = bias.astype(io_dtype)
    compute_dtype = x.dtype

    # ---- Lane-dense repack: p original rows per packed row ------------------
    p = 128 // idim if (idim < 128 and 128 % idim == 0) else 1
    K = p * idim
    N = p * odim

    x2 = x.reshape(M, idim)
    M_grp = _round_up(M, p)
    if M_grp != M:
        # Only <p tail rows; never a whole-tile pad (no extra HBM pass at scale).
        x2 = jnp.pad(x2, ((0, M_grp - M), (0, 0)))
    Mp = M_grp // p
    xp = x2.reshape(Mp, K)                            # contiguous reshape: free

    if p > 1:
        # Block-diagonal weight: packed_row @ kron(I_p, W) == concat(r_i @ W).
        w_bd = jnp.kron(jnp.eye(p, dtype=weight_t.dtype), weight_t)   # (K, N)
        b_bd = jnp.tile(bias.reshape(1, odim), (1, p))                # (1, N)
    else:
        w_bd = weight_t
        b_bd = bias.reshape(1, odim)

    # ---- Tile sizing (packed rows) ------------------------------------------
    sub_align = max(_sublane_align(compute_dtype), _sublane_align(out_dtype))
    tm_p = max(sub_align, _round_up(max(1, tm // p), sub_align))
    # Keep >= 2 grid steps where possible so v7x shards across both TCs.
    tm_p = min(tm_p, _round_up(pl.cdiv(Mp, 2), sub_align))
    if tm_p >= Mp:
        tm_p = Mp                    # single block == full array dim (allowed)
    grid = (pl.cdiv(Mp, tm_p),)      # partial last block handled by Pallas

    out_p = pl.pallas_call(
        _linear_relu_kernel,
        out_shape=jax.ShapeDtypeStruct((Mp, N), out_dtype),
        grid_spec=pltpu.PrefetchScalarGridSpec(
            num_scalar_prefetch=0,
            grid=grid,
            in_specs=[
                pl.BlockSpec((tm_p, K), lambda i: (i, 0)),   # streamed x
                pl.BlockSpec((K, N), lambda i: (0, 0)),      # resident weight
                pl.BlockSpec((1, N), lambda i: (0, 0)),      # resident bias
            ],
            out_specs=pl.BlockSpec((tm_p, N), lambda i: (i, 0)),
        ),
        compiler_params=pltpu.CompilerParams(
            dimension_semantics=("parallel",),
            # Double-buffered footprint at the default tile is ~6 MiB; 32 MiB
            # is the v6e/v7x scoped default and leaves headroom on v7x's
            # 64 MiB physical VMEM.
            vmem_limit_bytes=32 * 1024 * 1024,
        ),
    )(xp, w_bd, b_bd)

    out2 = out_p.reshape(M_grp, odim)                 # contiguous reshape: free
    if M_grp != M:
        out2 = out2[:M]
    return out2.reshape(B, T, odim)


def _reference(x, weight_t, bias):
    return jnp.maximum(jnp.einsum("btd,do->bto", x, weight_t) + bias, 0.0)


if __name__ == "__main__":
    # Small, module-consistent shapes: batch=2, seq=8, idim=32, odim=64
    B, T, idim, odim = 2, 8, 32, 64

    key = jax.random.PRNGKey(0)
    kx, kw, kb, kx2 = jax.random.split(key, 4)

    x = jax.random.normal(kx, (B, T, idim), dtype=jnp.float32)

    # Deterministic init mimicking torch.nn.Linear default: U(-1/sqrt(idim), 1/sqrt(idim)).
    # PyTorch stores weight as (odim, idim); keep (idim, odim) = W^T for the kernel.
    bound = 1.0 / (idim ** 0.5)
    weight_t = jax.random.uniform(kw, (idim, odim), jnp.float32, -bound, bound)
    bias = jax.random.uniform(kb, (odim,), jnp.float32, -bound, bound)

    # 1) Basic fp32 check (M divisible by the pack factor; single full block).
    out = jax.block_until_ready(linear_subsampling1(x, weight_t, bias))
    ref = _reference(x, weight_t, bias)
    assert out.shape == (B, T, odim)
    assert jnp.allclose(out, ref, atol=1e-5, rtol=1e-5)

    # 2) Ragged row count (exercises tail pad to pack factor + partial last block).
    B2, T2 = 3, 37
    x_r = jax.random.normal(kx2, (B2, T2, idim), dtype=jnp.float32)
    out_r = jax.block_until_ready(linear_subsampling1(x_r, weight_t, bias))
    ref_r = _reference(x_r, weight_t, bias)
    assert out_r.shape == (B2, T2, odim)
    assert jnp.allclose(out_r, ref_r, atol=1e-5, rtol=1e-5)

    # 3) bf16 I/O path: narrow reads AND writes; f32 accumulation inside.
    out_bf = jax.block_until_ready(
        linear_subsampling1(x, weight_t, bias, io_dtype=jnp.bfloat16))
    assert out_bf.shape == (B, T, odim)
    assert out_bf.dtype == jnp.bfloat16
    assert jnp.allclose(out_bf.astype(jnp.float32), ref, atol=5e-2, rtol=5e-2)

    print("KERNEL_OK")
</pallas_src>

<mosaic_0001>
module attributes {stable_mosaic.version = 11 : i64} {
  func.func @_linear_relu_kernel(%arg0: i32, %arg1: memref<4x128xf32, #tpu.memory_space<vmem>>, %arg2: memref<128x256xf32, #tpu.memory_space<vmem>>, %arg3: memref<1x256xf32, #tpu.memory_space<vmem>>, %arg4: memref<4x256xf32, #tpu.memory_space<vmem>>) attributes {dimension_semantics = [#tpu.dimension_semantics<parallel>], iteration_bounds = array<i64: 1>, scalar_prefetch = 0 : i64, scratch_operands = 0 : i64, tpu.core_type = #tpu.core_type<tc>, window_params = [{transform_indices = @transform_0, window_bounds = array<i64: 4, 128>}, {pipeline_mode = #tpu.pipeline_mode<synchronous>, transform_indices = @transform_1, window_bounds = array<i64: 128, 256>}, {pipeline_mode = #tpu.pipeline_mode<synchronous>, transform_indices = @transform_2, window_bounds = array<i64: 1, 256>}, {transform_indices = @transform_3, window_bounds = array<i64: 4, 256>}]} {
    %c0 = arith.constant 0 : index
    %c0_0 = arith.constant 0 : index
    %0 = vector.load %arg1[%c0, %c0_0] : memref<4x128xf32, #tpu.memory_space<vmem>>, vector<4x128xf32>
    %c0_1 = arith.constant 0 : index
    %c0_2 = arith.constant 0 : index
    %1 = vector.load %arg2[%c0_1, %c0_2] : memref<128x256xf32, #tpu.memory_space<vmem>>, vector<128x256xf32>
    %cst = arith.constant dense<0.000000e+00> : vector<4x256xf32>
    %2 = tpu.matmul %0, %1, %cst {dimension_numbers = #tpu.dot_dimension_numbers<[1], [0], [0], [1], [0, 0, 1, 1], [], []>} : vector<4x128xf32>, vector<128x256xf32>, vector<4x256xf32> -> vector<4x256xf32>
    %c0_3 = arith.constant 0 : index
    %c0_4 = arith.constant 0 : index
    %3 = vector.load %arg3[%c0_3, %c0_4] : memref<1x256xf32, #tpu.memory_space<vmem>>, vector<1x256xf32>
    %4 = vector.broadcast %3 : vector<1x256xf32> to vector<4x256xf32>
    %5 = arith.addf %2, %4 : vector<4x256xf32>
    %cst_5 = arith.constant 0.000000e+00 : f32
    %6 = vector.broadcast %cst_5 : f32 to vector<4x256xf32>
    %7 = arith.maximumf %5, %6 : vector<4x256xf32>
    %c0_6 = arith.constant 0 : index
    %c0_7 = arith.constant 0 : index
    %8 = vector.load %arg4[%c0_6, %c0_7] : memref<4x256xf32, #tpu.memory_space<vmem>>, vector<4x256xf32>
    tpu.vector_store %arg4[%c0_6, %c0_7], %7 {strides = array<i32>} : memref<4x256xf32, #tpu.memory_space<vmem>>, vector<4x256xf32>,
    return
  }
  func.func @transform_0(%arg0: i32) -> (i32, i32) {
    %c0_i32 = arith.constant 0 : i32
    %c0_i32_0 = arith.constant 0 : i32
    return %arg0, %c0_i32 : i32, i32
  }
  func.func @transform_1(%arg0: i32) -> (i32, i32) {
    %c0_i32 = arith.constant 0 : i32
    %c0_i32_0 = arith.constant 0 : i32
    %c0_i32_1 = arith.constant 0 : i32
    return %c0_i32, %c0_i32_0 : i32, i32
  }
  func.func @transform_2(%arg0: i32) -> (i32, i32) {
    %c0_i32 = arith.constant 0 : i32
    %c0_i32_0 = arith.constant 0 : i32
    %c0_i32_1 = arith.constant 0 : i32
    return %c0_i32, %c0_i32_0 : i32, i32
  }
  func.func @transform_3(%arg0: i32) -> (i32, i32) {
    %c0_i32 = arith.constant 0 : i32
    %c0_i32_0 = arith.constant 0 : i32
    return %arg0, %c0_i32 : i32, i32
  }
}

</mosaic_0001>

<bundles_post_ra>
// kernel: tpu_custom_call.1
= control target key start
LH: loop header
LB: loop body
LE: loop exit
PB: predicated region body
PF: predicated region fallthrough
CT: control target
= control target key end

     0   :  { %8 = vsyncpa [#allocation3], 0  ;;  %s362_s0 = inlined_call_operand.hbm [shape: f32[4,128], index: 0, kind: input, shape index: {}]   ;;  %s363_s1 = inlined_call_operand.hbm [shape: f32[128,256], index: 1, kind: input, shape index: {}]   ;;  %s364_s2 = inlined_call_operand.vmem [shape: f32[1,256], index: 2, kind: input, shape index: {}]   ;;  %s365_s3 = inlined_call_operand.hbm [shape: f32[4,256], index: 3, kind: output, shape index: {}]  }
   0x1   :  { %9 = vsyncpa [#allocation6], 0 }
   0x2   :  { %10 = vsyncpa [#allocation4], 0  ;;  %s290_s12 = smov [#allocation2]   ;;  %s291_s14 = smov [#allocation5]  }
   0x3   :  { %s17_s13 = sshll.u32 %s290_s12, 4  ;;  %s26_s15 = sshll.u32 %s291_s14, 4  ;;  %s18_s13 = int_to_ptr.vmem [resolvable:$true] %s17_s13  ;;  %s316_s15 = int_to_ptr.vmem [resolvable:$true] %s26_s15 }
   0x4   :  { %s218_s18 = scalar_lea.hbm %s362_s0, 64 }
   0x5   :  { %p219_p0 = scmp.ne.s32.totalorder %s362_s0, %s218_s18  ;;  %p222_p1 = scmp.lt.u32.totalorder %s218_s18, %s362_s0 }
   0x7   :  { %p224_p2 = pnand %p222_p1, %p219_p0 }
   0x9   :  { %227 = shalt.err (!%p224_p2)
}
   0xa   :  { %s228_s23 = scalar_lea.vmem %s18_s13, 64  ;;  %p233_p4 = scmp.lt.s32.totalorder %s18_s13, %s18_s13 }
   0xb   :  { %p229_p3 = scmp.ne.s32.totalorder %s18_s13, %s228_s23  ;;  %p234_p5 = scmp.lt.s32.totalorder %s228_s23, %s228_s23 }
   0xd   :  { %p235_p6 = por %p234_p5, %p233_p4 }
   0xf   :  { %p236_p7 = pnand %p235_p6, %p229_p3 }
  0x11   :  { %239 = shalt.err (!%p236_p7)
}
  0x12   :  { %20 = dma.hbm_to_vmem [thread:$0]  %s362_s0, 64, %s18_s13, [#allocation3]  }
  0x13   :  { %s240_s28 = scalar_lea.hbm %s363_s1, 4096 }
  0x14   :  { %p241_p8 = scmp.ne.s32.totalorder %s363_s1, %s240_s28  ;;  %p244_p9 = scmp.lt.u32.totalorder %s240_s28, %s363_s1 }
  0x16   :  { %p246_p10 = pnand %p244_p9, %p241_p8 }
  0x18   :  { %249 = shalt.err (!%p246_p10)
}
  0x19   :  { %s250_s6 = scalar_lea.vmem %s316_s15, 4096  ;;  %p255_p12 = scmp.lt.s32.totalorder %s316_s15, %s316_s15 }
  0x1a   :  { %p251_p11 = scmp.ne.s32.totalorder %s316_s15, %s250_s6  ;;  %p256_p13 = scmp.lt.s32.totalorder %s250_s6, %s250_s6 }
  0x1c   :  { %p257_p0 = por %p256_p13, %p255_p12 }
  0x1e   :  { %p258_p1 = pnand %p257_p0, %p251_p11 }
  0x20   :  { %261 = shalt.err (!%p258_p1)
}
  0x21   :  { %s292_s0 = smov 256   ;;  %s293_s7 = smov 16  }
  0x22   :  { %32 = dma.hbm_to_vmem [thread:$0]  %s363_s1, 4096, %s316_s15, [#allocation6], %s292_s0, %s292_s0, %s293_s7  }
  0x23   :  { %284 = dma.done.wait [#allocation3], 64  }
  0x24   :  { %285 = vsyncadd [#allocation3], 4294967232 }
  0x25   :  { %286 = dma.done.wait [#allocation6], 4096  }
  0x26   :  { %287 = vsyncadd [#allocation6], 4294963200  ;;  %v294_v0 = vmov 0.0   ;;  %v43_v1 = vld [vmem:[#allocation5 + $0x8] sm:$0xff]  ;;  %v45_v2 = vld [vmem:[#allocation5 + $0x18] sm:$0xff]  ;;  %v76_v50 = vlaneseq  ;;  %s295_s11 = smov [#allocation7]  }
  0x27   :  { %150 = vmatprep.mubr.f32.mxu0 %v294_v0  ;;  %v42_v3 = vld [vmem:[#allocation5] sm:$0xff]  ;;  %v180_v4 = vpack.c.bf16 %v45_v2, %v43_v1  ;;  %v44_v5 = vld [vmem:[#allocation5 + $0x10] sm:$0xff]  ;;  %v47_v6 = vld [vmem:[#allocation5 + $0x28] sm:$0xff]  ;;  %s170_s12 = sshll.u32 %s295_s11, 4  ;;  %s171_s12 = int_to_ptr.vmem [resolvable:$true] %s170_s12 }
  0x28   :  { %v49_v7 = vld [vmem:[#allocation5 + $0x38] sm:$0xff]  ;;  %v182_v8 = vpack.c.bf16 %v44_v5, %v42_v3  ;;  %v46_v10 = vld [vmem:[#allocation5 + $0x20] sm:$0xff]  ;;  %v48_v11 = vld [vmem:[#allocation5 + $0x30] sm:$0xff]  ;;  %v77_v51 = vshrl.u32 %v76_v50, 7  ;;  %s262_s13 = scalar_lea.vmem %s171_s12, 128  ;;  %p267_p3 = scmp.lt.s32.totalorder %s171_s12, %s171_s12 }
  0x29   :  { %v184_v9 = vpack.c.bf16 %v49_v7, %v47_v6  ;;  %v51_v12 = vld [vmem:[#allocation5 + $0x48] sm:$0xff]  ;;  %181 = vmatprep.subr.bf16.mxu0 %v180_v4  ;;  %v53_v13 = vld [vmem:[#allocation5 + $0x58] sm:$0xff]  ;;  %v186_v14 = vpack.c.bf16 %v48_v11, %v46_v10  ;;  %v50_v16 = vld [vmem:[#allocation5 + $0x40] sm:$0xff]  ;;  %p263_p2 = scmp.ne.s32.totalorder %s171_s12, %s262_s13  ;;  %p268_p4 = scmp.lt.s32.totalorder %s262_s13, %s262_s13 }
  0x2a   :  { %183 = vmatpush1.bf16.msra.mxu0 %v182_v8  ;;  %v188_v15 = vpack.c.bf16 %v53_v13, %v51_v12  ;;  %v52_v17 = vld [vmem:[#allocation5 + $0x50] sm:$0xff]  ;;  %v55_v18 = vld [vmem:[#allocation5 + $0x68] sm:$0xff]  ;;  %v57_v19 = vld [vmem:[#allocation5 + $0x78] sm:$0xff]  ;;  %v78_v52 = vsub.s32 0, %v77_v51  ;;  %v82_v54 = vsub.s32 1, %v77_v51 }
  0x2b   :  { %185 = vmatprep.subr.bf16.mxu0 %v184_v9  ;;  %v190_v20 = vpack.c.bf16 %v52_v17, %v50_v16  ;;  %v192_v21 = vpack.c.bf16 %v57_v19, %v55_v18  ;;  %v54_v22 = vld [vmem:[#allocation5 + $0x60] sm:$0xff]  ;;  %v56_v23 = vld [vmem:[#allocation5 + $0x70] sm:$0xff]  ;;  %v59_v24 = vld [vmem:[#allocation5 + $0x88] sm:$0xff]  ;;  %p269_p5 = por %p268_p4, %p267_p3 }
  0x2c   :  { %v61_v25 = vld [vmem:[#allocation5 + $0x98] sm:$0xff]  ;;  %v194_v26 = vpack.c.bf16 %v56_v23, %v54_v22  ;;  %v58_v28 = vld [vmem:[#allocation5 + $0x80] sm:$0xff]  ;;  %v60_v29 = vld [vmem:[#allocation5 + $0x90] sm:$0xff] }
  0x2d   :  { %v196_v27 = vpack.c.bf16 %v61_v25, %v59_v24  ;;  %v63_v30 = vld [vmem:[#allocation5 + $0xa8] sm:$0xff]  ;;  %v65_v31 = vld [vmem:[#allocation5 + $0xb8] sm:$0xff]  ;;  %v198_v32 = vpack.c.bf16 %v60_v29, %v58_v28  ;;  %v62_v34 = vld [vmem:[#allocation5 + $0xa0] sm:$0xff]  ;;  %p270_p6 = pnand %p269_p5, %p263_p2 }
  0x2e   :  { %187 = vmatpush1.bf16.msra.mxu0 %v186_v14  ;;  %v200_v33 = vpack.c.bf16 %v65_v31, %v63_v30  ;;  %v64_v35 = vld [vmem:[#allocation5 + $0xb0] sm:$0xff]  ;;  %v67_v36 = vld [vmem:[#allocation5 + $0xc8] sm:$0xff]  ;;  %v69_v37 = vld [vmem:[#allocation5 + $0xd8] sm:$0xff] }
  0x2f   :  { %189 = vmatprep.subr.bf16.mxu0 %v188_v15  ;;  %v202_v38 = vpack.c.bf16 %v64_v35, %v62_v34  ;;  %v204_v39 = vpack.c.bf16 %v69_v37, %v67_v36  ;;  %v66_v40 = vld [vmem:[#allocation5 + $0xc0] sm:$0xff]  ;;  %v68_v41 = vld [vmem:[#allocation5 + $0xd0] sm:$0xff]  ;;  %v71_v42 = vld [vmem:[#allocation5 + $0xe8] sm:$0xff] }
  0x30   :  { %v73_v43 = vld [vmem:[#allocation5 + $0xf8] sm:$0xff]  ;;  %v206_v44 = vpack.c.bf16 %v68_v41, %v66_v40  ;;  %v70_v46 = vld [vmem:[#allocation5 + $0xe0] sm:$0xff]  ;;  %v72_v47 = vld [vmem:[#allocation5 + $0xf0] sm:$0xff] }
  0x31   :  { %v208_v45 = vpack.c.bf16 %v73_v43, %v71_v42  ;;  %v210_v48 = vpack.c.bf16 %v72_v47, %v70_v46  ;;  %v41_v49 = vld [vmem:[#allocation2] sm:$0xf] }
  0x32   :  { %191 = vmatpush1.bf16.msra.mxu0 %v190_v20  ;;  %v74_v53 = vld [vmem:[%s364_s2] sm:$0x3] }
  0x33   :  { %193 = vmatprep.subr.bf16.mxu0 %v192_v21  ;;  %v79_v55 = vrot.slane %v74_v53, %v78_v52  ;;  %v83_v56 = vrot.slane %v74_v53, %v82_v54 }
  0x36   :  { %195 = vmatpush1.bf16.msra.mxu0 %v194_v26 }
  0x37   :  { %197 = vmatprep.subr.bf16.mxu0 %v196_v27 }
  0x3a   :  { %199 = vmatpush1.bf16.msra.mxu0 %v198_v32 }
  0x3b   :  { %201 = vmatprep.subr.bf16.mxu0 %v200_v33 }
  0x3e   :  { %203 = vmatpush1.bf16.msra.mxu0 %v202_v38 }
  0x3f   :  { %205 = vmatprep.subr.bf16.mxu0 %v204_v39 }
  0x42   :  { %207 = vmatpush1.bf16.msra.mxu0 %v206_v44 }
  0x43   :  { %209 = vmatprep.subr.bf16.mxu0 %v208_v45 }
  0x46   :  { %211 = vmatpush1.bf16.msra.mxu0 %v210_v48 }
  0x49   :  { %151 = vmatmul.mubr.f32.vlgmr.msra.gmra.mrb[0].mxu0 %v41_v49 }
 0x11c   :  { %v152_v57 = vpop.f32.mrb[0].mxu0 }
 0x11d   :  { %v153_v58 = vadd.f32 %v152_v57, %v79_v55  ;;  %v154_v59 = vpop.f32.mrb[1].mxu0 }
 0x11e   :  { %v155_v60 = vadd.f32 %v154_v59, %v83_v56 }
 0x11f   :  { %v157_v61 = vmax.f32 %v153_v58, 0.0 }
 0x120   :  { %v158_v62 = vmax.f32 %v155_v60, 0.0 }
 0x122   :  { %v161_v63 = vcombine.low %v157_v61, %v158_v62 }
 0x124   :  { %163 = vst [vmem:[#allocation7] sm:$0xff] %v161_v63 }
 0x125   :  { %273 = shalt.err (!%p270_p6)
}
 0x126   :  { %s274_s15 = scalar_lea.hbm %s365_s3, 128 }
 0x127   :  { %p275_p7 = scmp.ne.s32.totalorder %s365_s3, %s274_s15  ;;  %p278_p8 = scmp.lt.u32.totalorder %s274_s15, %s365_s3 }
 0x129   :  { %p280_p9 = pnand %p278_p8, %p275_p7 }
 0x12b   :  { %283 = shalt.err (!%p280_p9)
}
 0x12c   :  { %173 = dma.vmem_to_hbm [thread:$0]  %s171_s12, 128, %s365_s3, [#allocation4]  }
 0x12d   :  { %288 = dma.done.wait [#allocation4], 128  }
 0x12e   :  { %289 = vsyncadd [#allocation4], 4294967168 }
 0x12f   :  { %177 = vsyncpa [#allocation3], 1 }
 0x130   :  { %178 = vsyncpa [#allocation6], 1 }
 0x131   :  { %179 = vsyncpa [#allocation4], 1 }

</bundles_post_ra>
